<compile_context>
chip_gen: v7x
topology: tpu7x:2x2x1
jax: 0.10.0
libtpu: 0.0.40
codegen_flags: <defaults>
</compile_context>

<pallas_src>
import jax
import jax.numpy as jnp
from jax.experimental import pallas as pl
from jax.experimental.pallas import tpu as pltpu

LANE = 128
SUBLANE = 8


def _round_up(x, m):
    return ((x + m - 1) // m) * m


# ----------------------------------------------------------------------------
# Kernel
# ----------------------------------------------------------------------------
def highway_kernel(x_ref, w_ref, b_ref, o_ref):
    """x_ref: [tile_b, Dp]; w_ref: [Dp, 2*Dp]; b_ref: [1, 2*Dp]; o_ref: [tile_b, Dp]."""
    Dp = o_ref.shape[1]
    x_f32 = x_ref[...].astype(jnp.float32)          # residual term stays f32
    x_mm = x_f32.astype(w_ref.dtype)                # MXU operand (bf16 or f32)

    # Single fused matmul (fc1 | fc2) on the MXU, f32 accumulation, f32 bias.
    h = jnp.dot(x_mm, w_ref[...], preferred_element_type=jnp.float32) + b_ref[...]

    g = jnp.maximum(h[:, :Dp], 0.0)                 # relu    (VPU)   -- lane-aligned half
    t = jax.nn.sigmoid(h[:, Dp:])                   # sigmoid (EUP)   -- lane-aligned half
    o_ref[...] = (t * (g - x_f32) + x_f32).astype(o_ref.dtype)   # == g*t + (1-t)*x


# ----------------------------------------------------------------------------
# Parameter fusion (call ONCE at parameter-init time, not per forward)
# ----------------------------------------------------------------------------
def fuse_highway_params(w1, b1, w2, b2, *, compute_dtype=jnp.bfloat16):
    """Build the fused, lane-padded weight slab and bias once.

    w1, w2: [D_in, D_out] in (in, out) layout (transpose of nn.Linear.weight).
    b1, b2: [D_out] or [1, D_out].
    Returns (w_fused [Dp, 2*Dp] in compute_dtype, b_fused [1, 2*Dp] f32),
    where Dp = ceil(D/128)*128 so each half starts on a 128-lane boundary.
    """
    D_in, D_out = w1.shape
    assert w2.shape == (D_in, D_out)
    assert D_in == D_out, "Highway residual requires in_size == out_size"
    Dp = _round_up(D_out, LANE)

    def pad_w(w):
        return jnp.pad(w, ((0, Dp - D_in), (0, Dp - D_out)))

    def pad_b(b):
        b = jnp.reshape(b, (1, D_out))
        return jnp.pad(b, ((0, 0), (0, Dp - D_out)))

    w_fused = jnp.concatenate([pad_w(w1), pad_w(w2)], axis=1).astype(compute_dtype)
    b_fused = jnp.concatenate([pad_b(b1), pad_b(b2)], axis=1).astype(jnp.float32)
    return w_fused, b_fused


# ----------------------------------------------------------------------------
# Generation-aware tiling
# ----------------------------------------------------------------------------
def _vmem_budget():
    """Return (vmem budget bytes, multi_core?) for this TPU generation."""
    try:
        cap = int(pltpu.get_tpu_info().vmem_capacity_bytes)
    except Exception:
        cap = 64 * 1024 * 1024                      # conservative default
    if cap <= 64 * 1024 * 1024:
        # v7x-class: 64 MiB per TensorCore, 2 TCs/chip -> leave Mosaic headroom.
        return min(cap, 52 * 1024 * 1024), True
    # v6e / v5e: 128 MiB physical, single TensorCore.
    return min(cap - 24 * 1024 * 1024, 100 * 1024 * 1024), False


def _pick_tile_b(B, Dp, w_bytes, b_bytes, x_itemsize, out_itemsize, budget, multi_core):
    """Largest batch tile whose double-buffered x/out tiles fit next to the
    single-buffered weight slab; capped at 1024 (mem-roofline sweet spot)."""
    if B <= SUBLANE:
        return B
    avail = budget - w_bytes - 2 * b_bytes
    per_row = 2 * Dp * (x_itemsize + out_itemsize)       # x + out, 2 buffers each
    cap_rows = max(SUBLANE, (avail // max(per_row, 1)) // SUBLANE * SUBLANE)
    tile = min(1024, cap_rows)
    # Multi-core chips: >= 4 grid steps (>= 2 per TensorCore) so each core's
    # pipeline hides its x-tile DMA.  Single-TC chips: no pointless split.
    min_steps = 4 if multi_core else 1
    per_step = _round_up(-(-B // min_steps), SUBLANE)
    tile = min(tile, per_step)
    if tile >= B:
        return B                                         # full-dim block, always legal
    return max(SUBLANE, tile)


# ----------------------------------------------------------------------------
# Wrapper
# ----------------------------------------------------------------------------
def highway(x, w_fused, b_fused, *, tile_b=None):
    """x: [B, D]; (w_fused, b_fused) from fuse_highway_params()."""
    B, D = x.shape
    Dp = w_fused.shape[1] // 2
    assert w_fused.shape == (Dp, 2 * Dp)
    assert b_fused.shape == (1, 2 * Dp)
    assert Dp >= D and Dp - D < LANE, "fused params do not match x's feature dim"

    # Lane-align the feature dim (only when D is not a multiple of 128).
    x_in = jnp.pad(x, ((0, 0), (0, Dp - D))) if D != Dp else x
    out_dtype = x.dtype
    out_itemsize = jnp.dtype(out_dtype).itemsize

    w_bytes = w_fused.size * w_fused.dtype.itemsize
    b_bytes = b_fused.size * b_fused.dtype.itemsize
    budget, multi_core = _vmem_budget()

    if tile_b is None:
        tile_b = _pick_tile_b(B, Dp, w_bytes, b_bytes,
                              x_in.dtype.itemsize, out_itemsize, budget, multi_core)
    if tile_b != B and tile_b % SUBLANE != 0:
        tile_b = B                                   # keep block-shape constraints legal

    grid = (pl.cdiv(B, tile_b),)

    # VMEM: single-buffered weight slab + bias, double-buffered x/out tiles.
    vmem_need = (w_bytes + 2 * b_bytes
                 + 2 * tile_b * Dp * x_in.dtype.itemsize
                 + 2 * tile_b * Dp * out_itemsize)
    vmem_limit = int(min(budget, max(2 * vmem_need, 16 * 1024 * 1024)))

    cost = pl.CostEstimate(
        flops=4 * B * Dp * Dp,                       # 2 * B * Dp * (2*Dp) MACs -> flops
        transcendentals=B * Dp,                      # sigmoid
        bytes_accessed=int(x_in.size * x_in.dtype.itemsize + w_bytes + b_bytes
                           + B * Dp * out_itemsize),
    )

    # TODO(synk): for very large D (bf16 slab exceeding the v7x VMEM budget) add
    # matched output-column (N) tiling so the weight slab need not stay resident.

    def _call(single_buffer_weights):
        kw = {"pipeline_mode": pl.Buffered(1)} if single_buffer_weights else {}
        return pl.pallas_call(
            highway_kernel,
            out_shape=jax.ShapeDtypeStruct((B, Dp), out_dtype),
            grid_spec=pltpu.PrefetchScalarGridSpec(
                num_scalar_prefetch=0,
                grid=grid,
                in_specs=[
                    pl.BlockSpec((tile_b, Dp), lambda i: (i, 0)),          # x tile
                    pl.BlockSpec((Dp, 2 * Dp), lambda i: (0, 0), **kw),    # resident fused W
                    pl.BlockSpec((1, 2 * Dp), lambda i: (0, 0), **kw),     # resident fused bias
                ],
                out_specs=pl.BlockSpec((tile_b, Dp), lambda i: (i, 0)),
            ),
            compiler_params=pltpu.CompilerParams(
                dimension_semantics=("parallel",),
                vmem_limit_bytes=vmem_limit,
            ),
            cost_estimate=cost,
        )(x_in, w_fused, b_fused)

    try:
        out = _call(True)
    except Exception:
        # Fallback for jaxlibs that reject per-BlockSpec pipeline_mode: use the
        # default double-buffered weight slab (previously validated path).
        out = _call(False)

    if D != Dp:
        out = out[:, :D]
    return out


# ----------------------------------------------------------------------------
# Pure-JAX reference
# ----------------------------------------------------------------------------
def highway_ref(x, w1, b1, w2, b2):
    g = jnp.maximum(x @ w1 + b1, 0.0)
    t = jax.nn.sigmoid(x @ w2 + b2)
    return g * t + (1.0 - t) * x


if __name__ == "__main__":
    B, D = 64, 128  # small test shapes; in_size == out_size (residual)

    key = jax.random.PRNGKey(0)
    kx, kw1, kb1, kw2, kb2 = jax.random.split(key, 5)

    # Deterministic init mimicking nn.Linear's uniform(-1/sqrt(in), 1/sqrt(in)).
    bound = 1.0 / jnp.sqrt(jnp.float32(D))
    x = jax.random.normal(kx, (B, D), dtype=jnp.float32)
    w1 = jax.random.uniform(kw1, (D, D), jnp.float32, -bound, bound)
    b1 = jax.random.uniform(kb1, (1, D), jnp.float32, -bound, bound)
    w2 = jax.random.uniform(kw2, (D, D), jnp.float32, -bound, bound)
    b2 = jax.random.uniform(kb2, (1, D), jnp.float32, -bound, bound)

    ref = highway_ref(x, w1, b1, w2, b2)

    # Fused parameter slabs built ONCE (hoisted out of the per-forward path).
    w_f32, b_fused = fuse_highway_params(w1, b1, w2, b2, compute_dtype=jnp.float32)
    w_bf16, _ = fuse_highway_params(w1, b1, w2, b2, compute_dtype=jnp.bfloat16)

    # f32 MXU path: strict check.
    out_f32 = jax.block_until_ready(highway(x, w_f32, b_fused))
    assert out_f32.shape == (B, D)
    assert jnp.allclose(out_f32, ref, atol=1e-5, rtol=1e-5), "f32 mismatch vs reference"

    # bf16 weight/activation MXU path (f32 accumulation + f32 epilogue): loose check.
    out_bf16 = jax.block_until_ready(highway(x, w_bf16, b_fused))
    assert out_bf16.shape == (B, D)
    assert jnp.allclose(out_bf16, ref, atol=2e-2, rtol=2e-2), "bf16 mismatch vs reference"

    # Non-128-multiple D + ragged B exercises the lane-padding / masked-tile path.
    B2, D2 = 20, 96
    kx2, kw3, kb3, kw4, kb4 = jax.random.split(jax.random.PRNGKey(1), 5)
    bound2 = 1.0 / jnp.sqrt(jnp.float32(D2))
    x2 = jax.random.normal(kx2, (B2, D2), dtype=jnp.float32)
    w3 = jax.random.uniform(kw3, (D2, D2), jnp.float32, -bound2, bound2)
    b3 = jax.random.uniform(kb3, (1, D2), jnp.float32, -bound2, bound2)
    w4 = jax.random.uniform(kw4, (D2, D2), jnp.float32, -bound2, bound2)
    b4 = jax.random.uniform(kb4, (1, D2), jnp.float32, -bound2, bound2)
    wp, bp = fuse_highway_params(w3, b3, w4, b4, compute_dtype=jnp.float32)
    out2 = jax.block_until_ready(highway(x2, wp, bp))
    ref2 = highway_ref(x2, w3, b3, w4, b4)
    assert out2.shape == (B2, D2)
    assert jnp.allclose(out2, ref2, atol=1e-5, rtol=1e-5), "padded-D mismatch vs reference"

    print("KERNEL_OK")
</pallas_src>

<mosaic_0001>
module attributes {stable_mosaic.version = 11 : i64} {
  func.func @highway_kernel(%arg0: i32, %arg1: memref<16x128xf32, #tpu.memory_space<vmem>>, %arg2: memref<128x256xf32, #tpu.memory_space<vmem>>, %arg3: memref<1x256xf32, #tpu.memory_space<vmem>>, %arg4: memref<16x128xf32, #tpu.memory_space<vmem>>) attributes {dimension_semantics = [#tpu.dimension_semantics<parallel>], iteration_bounds = array<i64: 4>, scalar_prefetch = 0 : i64, scratch_operands = 0 : i64, tpu.core_type = #tpu.core_type<tc>, window_params = [{transform_indices = @transform_0, window_bounds = array<i64: 16, 128>}, {pipeline_mode = #tpu.pipeline_mode<synchronous>, transform_indices = @transform_1, window_bounds = array<i64: 128, 256>}, {pipeline_mode = #tpu.pipeline_mode<synchronous>, transform_indices = @transform_2, window_bounds = array<i64: 1, 256>}, {transform_indices = @transform_3, window_bounds = array<i64: 16, 128>}]} {
    %c0 = arith.constant 0 : index
    %c0_0 = arith.constant 0 : index
    %0 = vector.load %arg1[%c0, %c0_0] : memref<16x128xf32, #tpu.memory_space<vmem>>, vector<16x128xf32>
    %c0_1 = arith.constant 0 : index
    %c0_2 = arith.constant 0 : index
    %1 = vector.load %arg2[%c0_1, %c0_2] : memref<128x256xf32, #tpu.memory_space<vmem>>, vector<128x256xf32>
    %cst = arith.constant dense<0.000000e+00> : vector<16x256xf32>
    %2 = tpu.matmul %0, %1, %cst {dimension_numbers = #tpu.dot_dimension_numbers<[1], [0], [0], [1], [0, 0, 1, 1], [], []>} : vector<16x128xf32>, vector<128x256xf32>, vector<16x256xf32> -> vector<16x256xf32>
    %c0_3 = arith.constant 0 : index
    %c0_4 = arith.constant 0 : index
    %3 = vector.load %arg3[%c0_3, %c0_4] : memref<1x256xf32, #tpu.memory_space<vmem>>, vector<1x256xf32>
    %4 = vector.broadcast %3 : vector<1x256xf32> to vector<16x256xf32>
    %5 = arith.addf %2, %4 : vector<16x256xf32>
    %6 = vector.extract_strided_slice %5 {offsets = [0, 0], sizes = [16, 128], strides = [1, 1]} : vector<16x256xf32> to vector<16x128xf32>
    %cst_5 = arith.constant 0.000000e+00 : f32
    %7 = vector.broadcast %cst_5 : f32 to vector<16x128xf32>
    %8 = arith.maximumf %6, %7 : vector<16x128xf32>
    %9 = vector.extract_strided_slice %5 {offsets = [0, 128], sizes = [16, 128], strides = [1, 1]} : vector<16x256xf32> to vector<16x128xf32>
    %10 = arith.negf %9 : vector<16x128xf32>
    %11 = math.exp %10 : vector<16x128xf32>
    %cst_6 = arith.constant 1.000000e+00 : f32
    %12 = vector.broadcast %cst_6 : f32 to vector<16x128xf32>
    %13 = arith.addf %12, %11 : vector<16x128xf32>
    %14 = arith.divf %12, %13 : vector<16x128xf32>
    %15 = arith.subf %8, %0 : vector<16x128xf32>
    %16 = arith.mulf %14, %15 : vector<16x128xf32>
    %17 = arith.addf %16, %0 : vector<16x128xf32>
    %c0_7 = arith.constant 0 : index
    %c0_8 = arith.constant 0 : index
    %18 = vector.load %arg4[%c0_7, %c0_8] : memref<16x128xf32, #tpu.memory_space<vmem>>, vector<16x128xf32>
    tpu.vector_store %arg4[%c0_7, %c0_8], %17 {strides = array<i32>} : memref<16x128xf32, #tpu.memory_space<vmem>>, vector<16x128xf32>,
    return
  }
  func.func @transform_0(%arg0: i32) -> (i32, i32) {
    %c0_i32 = arith.constant 0 : i32
    %c0_i32_0 = arith.constant 0 : i32
    return %arg0, %c0_i32 : i32, i32
  }
  func.func @transform_1(%arg0: i32) -> (i32, i32) {
    %c0_i32 = arith.constant 0 : i32
    %c0_i32_0 = arith.constant 0 : i32
    %c0_i32_1 = arith.constant 0 : i32
    return %c0_i32, %c0_i32_0 : i32, i32
  }
  func.func @transform_2(%arg0: i32) -> (i32, i32) {
    %c0_i32 = arith.constant 0 : i32
    %c0_i32_0 = arith.constant 0 : i32
    %c0_i32_1 = arith.constant 0 : i32
    return %c0_i32, %c0_i32_0 : i32, i32
  }
  func.func @transform_3(%arg0: i32) -> (i32, i32) {
    %c0_i32 = arith.constant 0 : i32
    %c0_i32_0 = arith.constant 0 : i32
    return %arg0, %c0_i32 : i32, i32
  }
}

module attributes {stable_mosaic.version = 11 : i64} {
  func.func @highway_kernel(%arg0: i32, %arg1: memref<16x128xf32, #tpu.memory_space<vmem>>, %arg2: memref<128x256xf32, #tpu.memory_space<vmem>>, %arg3: memref<1x256xf32, #tpu.memory_space<vmem>>, %arg4: memref<16x128xf32, #tpu.memory_space<vmem>>) attributes {dimension_semantics = [#tpu.dimension_semantics<parallel>], iteration_bounds = array<i64: 4>, scalar_prefetch = 0 : i64, scratch_operands = 0 : i64, tpu.core_type = #tpu.core_type<tc>, window_params = [{transform_indices = @transform_0, window_bounds = array<i64: 16, 128>}, {pipeline_mode = #tpu.pipeline_mode<synchronous>, transform_indices = @transform_1, window_bounds = array<i64: 128, 256>}, {pipeline_mode = #tpu.pipeline_mode<synchronous>, transform_indices = @transform_2, window_bounds = array<i64: 1, 256>}, {transform_indices = @transform_3, window_bounds = array<i64: 16, 128>}]} {
    %c0 = arith.constant 0 : index
    %c0_0 = arith.constant 0 : index
    %0 = vector.load %arg1[%c0, %c0_0] : memref<16x128xf32, #tpu.memory_space<vmem>>, vector<16x128xf32>
    %c0_1 = arith.constant 0 : index
    %c0_2 = arith.constant 0 : index
    %1 = vector.load %arg2[%c0_1, %c0_2] : memref<128x256xf32, #tpu.memory_space<vmem>>, vector<128x256xf32>
    %cst = arith.constant dense<0.000000e+00> : vector<16x256xf32>
    %2 = tpu.matmul %0, %1, %cst {dimension_numbers = #tpu.dot_dimension_numbers<[1], [0], [0], [1], [0, 0, 1, 1], [], []>} : vector<16x128xf32>, vector<128x256xf32>, vector<16x256xf32> -> vector<16x256xf32>
    %c0_3 = arith.constant 0 : index
    %c0_4 = arith.constant 0 : index
    %3 = vector.load %arg3[%c0_3, %c0_4] : memref<1x256xf32, #tpu.memory_space<vmem>>, vector<1x256xf32>
    %4 = vector.broadcast %3 : vector<1x256xf32> to vector<16x256xf32>
    %5 = arith.addf %2, %4 : vector<16x256xf32>
    %6 = vector.extract_strided_slice %5 {offsets = [0, 0], sizes = [16, 128], strides = [1, 1]} : vector<16x256xf32> to vector<16x128xf32>
    %cst_5 = arith.constant 0.000000e+00 : f32
    %7 = vector.broadcast %cst_5 : f32 to vector<16x128xf32>
    %8 = arith.maximumf %6, %7 : vector<16x128xf32>
    %9 = vector.extract_strided_slice %5 {offsets = [0, 128], sizes = [16, 128], strides = [1, 1]} : vector<16x256xf32> to vector<16x128xf32>
    %10 = arith.negf %9 : vector<16x128xf32>
    %11 = math.exp %10 : vector<16x128xf32>
    %cst_6 = arith.constant 1.000000e+00 : f32
    %12 = vector.broadcast %cst_6 : f32 to vector<16x128xf32>
    %13 = arith.addf %12, %11 : vector<16x128xf32>
    %14 = arith.divf %12, %13 : vector<16x128xf32>
    %15 = arith.subf %8, %0 : vector<16x128xf32>
    %16 = arith.mulf %14, %15 : vector<16x128xf32>
    %17 = arith.addf %16, %0 : vector<16x128xf32>
    %c0_7 = arith.constant 0 : index
    %c0_8 = arith.constant 0 : index
    %18 = vector.load %arg4[%c0_7, %c0_8] : memref<16x128xf32, #tpu.memory_space<vmem>>, vector<16x128xf32>
    tpu.vector_store %arg4[%c0_7, %c0_8], %17 {strides = array<i32>} : memref<16x128xf32, #tpu.memory_space<vmem>>, vector<16x128xf32>,
    return
  }
  func.func @transform_0(%arg0: i32) -> (i32, i32) {
    %c0_i32 = arith.constant 0 : i32
    %c0_i32_0 = arith.constant 0 : i32
    return %arg0, %c0_i32 : i32, i32
  }
  func.func @transform_1(%arg0: i32) -> (i32, i32) {
    %c0_i32 = arith.constant 0 : i32
    %c0_i32_0 = arith.constant 0 : i32
    %c0_i32_1 = arith.constant 0 : i32
    return %c0_i32, %c0_i32_0 : i32, i32
  }
  func.func @transform_2(%arg0: i32) -> (i32, i32) {
    %c0_i32 = arith.constant 0 : i32
    %c0_i32_0 = arith.constant 0 : i32
    %c0_i32_1 = arith.constant 0 : i32
    return %c0_i32, %c0_i32_0 : i32, i32
  }
  func.func @transform_3(%arg0: i32) -> (i32, i32) {
    %c0_i32 = arith.constant 0 : i32
    %c0_i32_0 = arith.constant 0 : i32
    return %arg0, %c0_i32 : i32, i32
  }
}

</mosaic_0001>

<bundles_post_ra>
// kernel: tpu_custom_call.1
= control target key start
LH: loop header
LB: loop body
LE: loop exit
PB: predicated region body
PF: predicated region fallthrough
CT: control target
= control target key end

     0   :  { %8 = vsyncpa [#allocation3], 0  ;;  %s951_s0 = inlined_call_operand.hbm [shape: f32[64,128], index: 0, kind: input, shape index: {}]   ;;  %s952_s1 = inlined_call_operand.hbm [shape: f32[128,256], index: 1, kind: input, shape index: {}]   ;;  %s953_s2 = inlined_call_operand.vmem [shape: f32[1,256], index: 2, kind: input, shape index: {}]   ;;  %s954_s3 = inlined_call_operand.hbm [shape: f32[64,128], index: 3, kind: output, shape index: {}]  }
   0x1   :  { %10 = vsyncpa [#allocation3 + $0x1], 0 }
   0x2   :  { %11 = vsyncpa [#allocation6], 0 }
   0x3   :  { %12 = vsyncpa [#allocation4], 0 }
   0x4   :  { %14 = vsyncpa [#allocation4 + $0x1], 0  ;;  %s748_s12 = smov 0   ;;  %s750_s13 = smov 0  }
   0x5   :  { %s752_s14 = smov 0   ;;  %s754_s15 = smov 0  }
   0x6 LB: > { %s769_s16 = sadd.s32 4294967295, %s716_s15   ;;  %s448_s17 = sadd.s32 4294967294, %s716_s15   ;;  %s716_s15 = sphi %s754_s15, %s973_s15   ;;  %s712_s14 = sphi %s752_s14, %s972_s14   ;;  %s708_s13 = sphi %s750_s13, %s971_s13   ;;  %s704_s12 = sphi %s748_s12, %s970_s12  }
   0x7   : > { %p40_p0 = scmp.ne.s32.totalorder %s708_s13, %s704_s12  ;;  %p955_p1 = scmp.eq.s32.totalorder %s769_s16, 0 }
   0x8   : > { %p112_p3 = scmp.eq.s32.totalorder %s448_s17, 3  ;;  %p449_p5 = scmp.ge.s32.totalorder %s716_s15, 1 }
   0x9   : > { %p778_p4 = por %p955_p1, %p40_p0  ;;  %p119_p7 = scmp.lt.s32.totalorder %s716_s15, 5 }
   0xa   : > { %p783_p6 = por %p112_p3, %p40_p0  ;;  %s718_s21 = smov [#allocation5]  }
   0xb   : > { %s958_s18 = scalar_select %p778_p4, 1, 0 }
   0xc   : > { %s959_s19 = scalar_select %p783_p6, 1, 0 }
   0xd   : > { %p788_p8 = pnand %p449_p5, %p119_p7  ;;  %s131_s22 = sshll.u32 %s718_s21, 4  ;;  %s132_s22 = int_to_ptr.vmem [resolvable:$true] %s131_s22 }
   0xe   : > { %s801_s24 = sadd.s32 1, %s716_s15   ;;  %s27_s25 = sadd.s32 1, %s712_s14 }
   0xf   : > { %s960_s20 = scalar_select %p788_p8, 1, 0 }
  0x10   : > { %p524_p9 = pneg %p788_p8  ;;  %s24_s26 = ssub.s32 %s716_s15, %s801_s24 }
  0x11   : > { %s588_s29 = scalar_lea.hbm %s952_s1, 4096 }
  0x12   : > { %p796_p10 = pnand %p524_p9, %p955_p1  ;;  %p589_p11 = scmp.ne.s32.totalorder %s952_s1, %s588_s29 }
  0x13   : > { %p595_p3 = scmp.lt.u32.totalorder %s588_s29, %s952_s1 }
  0x14   : > { %p590_p12 = pneg %p796_p10 }
  0x16   : > { %p591_p13 = pnand %p590_p12, %p589_p11 }
  0x18   : > { %p592_p0 = pneg %p591_p13 }
  0x1a   : > { %p597_p5 = pnand %p595_p3, %p592_p0 }
  0x1c   : > { %600 = shalt.err (!%p597_p5)
}
  0x1d   : > { %s601_s7 = scalar_lea.vmem %s132_s22, 4096  ;;  %p609_p2 = scmp.lt.s32.totalorder %s132_s22, %s132_s22 }
  0x1e   : > { %p602_p7 = scmp.ne.s32.totalorder %s132_s22, %s601_s7  ;;  %p610_p6 = scmp.lt.s32.totalorder %s601_s7, %s601_s7 }
  0x20   : > { %p604_p9 = pnand %p602_p7, %p590_p12  ;;  %p611_p4 = por %p610_p6, %p609_p2 }
  0x22   : > { %p605_p1 = pneg %p604_p9 }
  0x24   : > { %p612_p8 = pnand %p611_p4, %p605_p1 }
  0x26   : > { %615 = shalt.err (!%p612_p8)
}
  0x27   : > { %s719_s8 = smov 256   ;;  %s720_s9 = smov 16  }
  0x28   : > { %527 = dma.hbm_to_vmem [thread:$0]  (!%p796_p10), %s952_s1, 4096, %s132_s22, [#allocation6], %s719_s8, %s719_s8, %s720_s9  }
  0x29   : > { %p25_p11 = scmp.eq.s32.totalorder %s24_s26, 0  ;;  %p34_p2 = scmp.ne.s32.totalorder %s712_s14, %s708_s13 }
  0x2a   : > { %p35_p1 = scmp.eq.s32.totalorder %s716_s15, 0  ;;  %p537_p4 = scmp.lt.s32.totalorder %s716_s15, 4 }
  0x2b   : > { %s827_s17 = scalar_select %p25_p11, %s712_s14, %s27_s25  }
  0x2c   : > { %p36_p6 = por %p35_p1, %p34_p2  ;;  %p962_p8 = scmp.eq.s32.totalorder %s769_s16, 3 }
  0x2d   : > { %s148_s27 = sand.u32 1, %s712_s14   ;;  %s466_s28 = sshll.u32 %s716_s15, 8 }
  0x2e   : > { %p831_p12 = por %p962_p8, %p34_p2  ;;  %s452_s29 = sshll.u32 %s148_s27, 4 }
  0x2f   : > { %s840_s4 = scalar_lea.hbm %s951_s0, %s466_s28  ;;  %s152_s22 = scalar_lea.vmem [#allocation2], %s452_s29 }
  0x30   : > { %s159_s25 = sshll.u32 %s152_s22, 4  ;;  %p842_p10 = pnand %p537_p4, %p36_p6  ;;  %s846_s25 = int_to_ptr.vmem [resolvable:$true] %s159_s25 }
  0x31   : > { %s848_s5 = scalar_lea.sflag [#allocation3], %s148_s27  ;;  %s616_s6 = scalar_lea.hbm %s840_s4, 256 }
  0x32   : > { %p617_p13 = scmp.ne.s32.totalorder %s840_s4, %s616_s6  ;;  %p618_p0 = pneg %p842_p10 }
  0x33   : > { %s621_s9 = scalar_lea.hbm %s951_s0, 1024  ;;  %p622_p7 = scmp.lt.u32.totalorder %s840_s4, %s951_s0 }
  0x34   : > { %p619_p3 = pnand %p618_p0, %p617_p13  ;;  %p623_p9 = scmp.lt.u32.totalorder %s621_s9, %s616_s6 }
  0x35   : > { %p625_p2 = scmp.lt.u32.totalorder %s616_s6, %s840_s4 }
  0x36   : > { %p620_p5 = pneg %p619_p3  ;;  %p624_p11 = por %p623_p9, %p622_p7 }
  0x38   : > { %p626_p1 = por %p625_p2, %p624_p11 }
  0x3a   : > { %p627_p4 = pnand %p626_p1, %p620_p5 }
  0x3c   : > { %630 = shalt.err (!%p627_p4)
}
  0x3d   : > { %s631_s27 = scalar_lea.vmem %s846_s25, 256  ;;  %s721_s28 = smov [#allocation2]  }
  0x3e   : > { %p632_p6 = scmp.ne.s32.totalorder %s846_s25, %s631_s27  ;;  %s636_s29 = sshll.u32 %s721_s28, 4  ;;  %s637_s29 = int_to_ptr.vmem [resolvable:$false] %s636_s29 }
  0x3f   : > { %s638_s23 = scalar_lea.vmem %s637_s29, 512  ;;  %p639_p3 = scmp.lt.s32.totalorder %s846_s25, %s637_s29 }
  0x40   : > { %p634_p8 = pnand %p632_p6, %p618_p0  ;;  %p640_p7 = scmp.lt.s32.totalorder %s638_s23, %s631_s27 }
  0x42   : > { %p635_p13 = pneg %p634_p8  ;;  %p641_p9 = por %p640_p7, %p639_p3 }
  0x44   : > { %p642_p11 = pnand %p641_p9, %p635_p13 }
  0x46   : > { %645 = shalt.err (!%p642_p11)
}
  0x47   : > { %s722_s30 = smov 128   ;;  %s723_s22 = smov 8  }
  0x48   : > { %531 = dma.hbm_to_vmem [thread:$0]  (!%p842_p10), %s840_s4, 256, %s846_s25, %s848_s5, %s722_s30, %s722_s30, %s723_s22  }
  0x49   : > { %p965_p0 = scmp.ne.s32.totalorder %s960_s20, 0 }
  0x4a   : > { %s879_s6 = sand.u32 (!%p965_p0), 1, %s708_s13   ;;  %p966_p5 = scmp.ne.s32.totalorder (!%p965_p0), %s958_s18, 0 }
  0x4b   : > { %171 = sbr.rel (%p965_p0) target bundleno = 382 (0x17e), region = 32  ;;  %s456_s7 = sshll.u32 (!%p965_p0), %s879_s6, 4 }
  0x4c   : > { %s174_s8 = scalar_lea.sflag (!%p965_p0), [#allocation3], %s879_s6  ;;  %s885_s9 = scalar_lea.vmem (!%p965_p0), [#allocation2], %s456_s7 }
  0x52   : > { %691 = dma.done.wait (%p966_p5), %s174_s8, 256  }
  0x53   : > { %693 = vsyncadd (%p966_p5), %s174_s8, 4294967040  ;;  %p967_p10 = scmp.eq.s32.totalorder %s769_s16, 0 }
  0x55   : > { %695 = dma.done.wait (%p967_p10), [#allocation6], 4096   ;;  %p968_p2 = pmov %p967_p10 }
  0x56   : > { %v724_v0 = vmov 0.0   ;;  %v209_v1 = vld [vmem:[#allocation5 + $0x8] sm:$0xff]  ;;  %v211_v2 = vld [vmem:[#allocation5 + $0x18] sm:$0xff]  ;;  %v208_v3 = vld [vmem:[#allocation5] sm:$0xff]  ;;  %v242_v51 = vlaneseq  ;;  %s467_s4 = sshll.u32 %s769_s16, 8  ;;  %s203_s25 = scalar_lea.vmem [#allocation7], %s456_s7 }
  0x57   : > { %697 = vsyncadd (%p968_p2), [#allocation6], 4294963200  ;;  %316 = vmatprep.mubr.f32.mxu0 %v724_v0  ;;  %322 = vmatprep.mubr.f32.mxu1 %v724_v0  ;;  %v468_v4 = vpack.c.bf16 %v211_v2, %v209_v1  ;;  %v210_v5 = vld [vmem:[#allocation5 + $0x10] sm:$0xff]  ;;  %v213_v6 = vld [vmem:[#allocation5 + $0x28] sm:$0xff]  ;;  %s365_s26 = sshll.u32 %s203_s25, 4  ;;  %s906_s11 = scalar_lea.hbm %s954_s3, %s467_s4  ;;  %s908_s26 = int_to_ptr.vmem [resolvable:$true] %s365_s26 }
  0x58   : > { %v215_v7 = vld [vmem:[#allocation5 + $0x38] sm:$0xff]  ;;  %v470_v8 = vpack.c.bf16 %v210_v5, %v208_v3  ;;  %v212_v10 = vld [vmem:[#allocation5 + $0x20] sm:$0xff]  ;;  %v214_v11 = vld [vmem:[#allocation5 + $0x30] sm:$0xff]  ;;  %v243_v52 = vshrl.u32 %v242_v51, 7  ;;  %s352_s16 = scalar_lea.sflag [#allocation4], %s879_s6  ;;  %s646_s27 = scalar_lea.vmem %s908_s26, 256 }
  0x59   : > { %v472_v9 = vpack.c.bf16 %v215_v7, %v213_v6  ;;  %v217_v12 = vld [vmem:[#allocation5 + $0x48] sm:$0xff]  ;;  %469 = vmatprep.subr.bf16.mxu0 %v468_v4  ;;  %500 = vmatprep.subr.bf16.mxu1 %v468_v4  ;;  %v219_v13 = vld [vmem:[#allocation5 + $0x58] sm:$0xff]  ;;  %v474_v14 = vpack.c.bf16 %v214_v11, %v212_v10  ;;  %v216_v16 = vld [vmem:[#allocation5 + $0x40] sm:$0xff]  ;;  %p647_p1 = scmp.ne.s32.totalorder %s908_s26, %s646_s27  ;;  %s725_s28 = smov [#allocation7]  }
  0x5a   : > { %471 = vmatpush1.bf16.msra.mxu0 %v470_v8  ;;  %508 = vmatpush1.bf16.msra.mxu1 %v470_v8  ;;  %v476_v15 = vpack.c.bf16 %v219_v13, %v217_v12  ;;  %v218_v17 = vld [vmem:[#allocation5 + $0x50] sm:$0xff]  ;;  %v221_v18 = vld [vmem:[#allocation5 + $0x68] sm:$0xff]  ;;  %v223_v19 = vld [vmem:[#allocation5 + $0x78] sm:$0xff]  ;;  %v248_v53 = vsub.s32 1, %v243_v52  ;;  %v244_v0 = vsub.s32 0, %v243_v52  ;;  %s650_s29 = sshll.u32 %s725_s28, 4  ;;  %s651_s29 = int_to_ptr.vmem [resolvable:$false] %s650_s29 }
  0x5b   : > { %473 = vmatprep.subr.bf16.mxu0 %v472_v9  ;;  %501 = vmatprep.subr.bf16.mxu1 %v472_v9  ;;  %v478_v20 = vpack.c.bf16 %v218_v17, %v216_v16  ;;  %v480_v21 = vpack.c.bf16 %v223_v19, %v221_v18  ;;  %v220_v22 = vld [vmem:[#allocation5 + $0x60] sm:$0xff]  ;;  %v222_v23 = vld [vmem:[#allocation5 + $0x70] sm:$0xff]  ;;  %v225_v24 = vld [vmem:[#allocation5 + $0x88] sm:$0xff]  ;;  %p648_p4 = pnand %p647_p1, %p831_p12  ;;  %s652_s23 = scalar_lea.vmem %s651_s29, 512 }
  0x5c   : > { %v227_v25 = vld [vmem:[#allocation5 + $0x98] sm:$0xff]  ;;  %v482_v26 = vpack.c.bf16 %v222_v23, %v220_v22  ;;  %v224_v28 = vld [vmem:[#allocation5 + $0x80] sm:$0xff]  ;;  %v226_v29 = vld [vmem:[#allocation5 + $0x90] sm:$0xff]  ;;  %p653_p8 = scmp.lt.s32.totalorder %s908_s26, %s651_s29  ;;  %p654_p13 = scmp.lt.s32.totalorder %s652_s23, %s646_s27 }
  0x5d   : > { %v484_v27 = vpack.c.bf16 %v227_v25, %v225_v24  ;;  %v229_v30 = vld [vmem:[#allocation5 + $0xa8] sm:$0xff]  ;;  %v231_v31 = vld [vmem:[#allocation5 + $0xb8] sm:$0xff]  ;;  %v486_v32 = vpack.c.bf16 %v226_v29, %v224_v28  ;;  %v228_v34 = vld [vmem:[#allocation5 + $0xa0] sm:$0xff]  ;;  %p649_p6 = pneg %p648_p4 }
  0x5e   : > { %475 = vmatpush1.bf16.msra.mxu0 %v474_v14  ;;  %509 = vmatpush1.bf16.msra.mxu1 %v474_v14  ;;  %v488_v33 = vpack.c.bf16 %v231_v31, %v229_v30  ;;  %v230_v35 = vld [vmem:[#allocation5 + $0xb0] sm:$0xff]  ;;  %v233_v36 = vld [vmem:[#allocation5 + $0xc8] sm:$0xff]  ;;  %v235_v37 = vld [vmem:[#allocation5 + $0xd8] sm:$0xff]  ;;  %p655_p3 = por %p654_p13, %p653_p8 }
  0x5f   : > { %477 = vmatprep.subr.bf16.mxu0 %v476_v15  ;;  %502 = vmatprep.subr.bf16.mxu1 %v476_v15  ;;  %v490_v38 = vpack.c.bf16 %v230_v35, %v228_v34  ;;  %v492_v39 = vpack.c.bf16 %v235_v37, %v233_v36  ;;  %v232_v40 = vld [vmem:[#allocation5 + $0xc0] sm:$0xff]  ;;  %v234_v41 = vld [vmem:[#allocation5 + $0xd0] sm:$0xff]  ;;  %v237_v42 = vld [vmem:[#allocation5 + $0xe8] sm:$0xff] }
  0x60   : > { %v239_v43 = vld [vmem:[#allocation5 + $0xf8] sm:$0xff]  ;;  %v494_v44 = vpack.c.bf16 %v234_v41, %v232_v40  ;;  %v236_v46 = vld [vmem:[#allocation5 + $0xe0] sm:$0xff]  ;;  %v238_v47 = vld [vmem:[#allocation5 + $0xf0] sm:$0xff]  ;;  %p656_p7 = pnand %p655_p3, %p649_p6 }
  0x61   : > { %v496_v45 = vpack.c.bf16 %v239_v43, %v237_v42  ;;  %v498_v48 = vpack.c.bf16 %v238_v47, %v236_v46  ;;  %v206_v49 = vld [vmem:[%s885_s9] sm:$0xff]  ;;  %v207_v50 = vld [vmem:[%s885_s9 + $0x8] sm:$0xff] }
  0x62   : > { %479 = vmatpush1.bf16.msra.mxu0 %v478_v20  ;;  %510 = vmatpush1.bf16.msra.mxu1 %v478_v20  ;;  %v240_v54 = vld [vmem:[%s953_s2] sm:$0x3] }
  0x63   : > { %481 = vmatprep.subr.bf16.mxu0 %v480_v21  ;;  %503 = vmatprep.subr.bf16.mxu1 %v480_v21  ;;  %v249_v55 = vrot.slane %v240_v54, %v248_v53  ;;  %v245_v2 = vrot.slane %v240_v54, %v244_v0 }
  0x66   : > { %483 = vmatpush1.bf16.msra.mxu0 %v482_v26  ;;  %511 = vmatpush1.bf16.msra.mxu1 %v482_v26 }
  0x67   : > { %485 = vmatprep.subr.bf16.mxu0 %v484_v27  ;;  %504 = vmatprep.subr.bf16.mxu1 %v484_v27 }
  0x6a   : > { %487 = vmatpush1.bf16.msra.mxu0 %v486_v32  ;;  %512 = vmatpush1.bf16.msra.mxu1 %v486_v32 }
  0x6b   : > { %489 = vmatprep.subr.bf16.mxu0 %v488_v33  ;;  %505 = vmatprep.subr.bf16.mxu1 %v488_v33 }
  0x6e   : > { %491 = vmatpush1.bf16.msra.mxu0 %v490_v38  ;;  %513 = vmatpush1.bf16.msra.mxu1 %v490_v38 }
  0x6f   : > { %493 = vmatprep.subr.bf16.mxu0 %v492_v39  ;;  %506 = vmatprep.subr.bf16.mxu1 %v492_v39 }
  0x72   : > { %495 = vmatpush1.bf16.msra.mxu0 %v494_v44  ;;  %514 = vmatpush1.bf16.msra.mxu1 %v494_v44 }
  0x73   : > { %497 = vmatprep.subr.bf16.mxu0 %v496_v45  ;;  %507 = vmatprep.subr.bf16.mxu1 %v496_v45 }
  0x76   : > { %499 = vmatpush1.bf16.msra.mxu0 %v498_v48  ;;  %515 = vmatpush1.bf16.msra.mxu1 %v498_v48 }
  0x79   : > { %317 = vmatmul.mubr.f32.vlgmr.msra.gmra.mrb[0].mxu0 %v206_v49  ;;  %323 = vmatmul.mubr.f32.vlgmr.msra.gmra.mrb[0].mxu1 %v207_v50 }
 0x14c   : > { %v318_v56 = vpop.f32.mrb[0].mxu0  ;;  %v324_v57 = vpop.f32.mrb[0].mxu1 }
 0x14d   : > { %v320_v58 = vpop.f32.mrb[1].mxu0  ;;  %v326_v59 = vpop.f32.mrb[1].mxu1  ;;  %v319_v6 = vadd.f32 %v318_v56, %v245_v2  ;;  %v325_v7 = vadd.f32 %v324_v57, %v245_v2 }
 0x14e   : > { %v321_v60 = vadd.f32 %v320_v58, %v249_v55  ;;  %v327_v61 = vadd.f32 %v326_v59, %v249_v55 }
 0x14f   : > { %v329_v8 = vmax.f32 %v319_v6, 0.0  ;;  %v330_v9 = vmax.f32 %v325_v7, 0.0 }
 0x150   : > { %v459_v62 = vmul.f32 -1.442695, %v321_v60  ;;  %v460_v63 = vmul.f32 -1.442695, %v327_v61 }
 0x151   : > { %v343_v10 = vsub.f32 %v329_v8, %v206_v49  ;;  %v344_v12 = vsub.f32 %v330_v9, %v207_v50 }
 0x152   : > { %580 = vpow2.f32 %v459_v62 }
 0x153   : > { %582 = vpow2.f32 %v460_v63 }
 0x15c   : > { %v581_v1 = vpop.eup %580 }
 0x15d   : > { %v583_v3 = vpop.eup %582  ;;  %v337_v4 = vadd.f32 1.0, %v581_v1 }
 0x15e   : > { %v338_v5 = vadd.f32 1.0, %v583_v3 }
 0x15f   : > { %584 = vrcp.f32 %v337_v4 }
 0x160   : > { %586 = vrcp.f32 %v338_v5 }
 0x169   : > { %v585_v11 = vpop.eup %584 }
 0x16a   : > { %v587_v13 = vpop.eup %586  ;;  %v345_v14 = vmul.f32 %v585_v11, %v343_v10 }
 0x16b   : > { %v346_v15 = vmul.f32 %v587_v13, %v344_v12 }
 0x16c   : > { %v347_v16 = vadd.f32 %v345_v14, %v206_v49 }
 0x16d   : > { %v348_v17 = vadd.f32 %v346_v15, %v207_v50 }
 0x16e   : > { %349 = vst [vmem:[%s203_s25] sm:$0xff] %v347_v16 }
 0x16f   : > { %350 = vst [vmem:[%s203_s25 + $0x8] sm:$0xff] %v348_v17 }
 0x170   : > { %659 = shalt.err (!%p656_p7)
}
 0x171   : > { %s660_s30 = scalar_lea.hbm %s906_s11, 256  ;;  %s664_s8 = scalar_lea.hbm %s954_s3, 1024 }
 0x172   : > { %p661_p9 = scmp.ne.s32.totalorder %s906_s11, %s660_s30  ;;  %p665_p5 = scmp.lt.u32.totalorder %s906_s11, %s954_s3 }
 0x173   : > { %p666_p10 = scmp.lt.u32.totalorder %s664_s8, %s660_s30  ;;  %p668_p1 = scmp.lt.u32.totalorder %s660_s30, %s906_s11 }
 0x174   : > { %p662_p11 = pnand %p661_p9, %p831_p12 }
 0x175   : > { %p667_p2 = por %p666_p10, %p665_p5 }
 0x176   : > { %p663_p0 = pneg %p662_p11 }
 0x177   : > { %p669_p4 = por %p668_p1, %p667_p2 }
 0x179   : > { %p670_p6 = pnand %p669_p4, %p663_p0 }
 0x17b   : > { %673 = shalt.err (!%p670_p6)
}
 0x17c   : > { %s726_s20 = smov 128   ;;  %s727_s4 = smov 8  }
 0x17d   : > { %522 = dma.vmem_to_hbm [thread:$0]  (%p831_p12), %s908_s26, 256, %s906_s11, %s352_s16, %s726_s20, %s726_s20, %s727_s4  }
 0x17e PF: > { %p539_p8 = scmp.ge.s32.totalorder %s716_s15, 2  ;;  %s380_s25 = sand.u32 1, %s704_s12  }
 0x17f   : > { %p969_p13 = scmp.ne.s32.totalorder %s959_s19, 0  ;;  %s381_s5 = scalar_lea.sflag [#allocation4], %s380_s25 }
 0x181   : > { %p533_p3 = pnand %p539_p8, %p969_p13 }
 0x183   : > { %699 = dma.done.wait (!%p533_p3), %s381_s5, 256  }
 0x184   : > { %701 = vsyncadd (!%p533_p3), %s381_s5, 4294967040  ;;  %p17_p7 = scmp.ge.s32.totalorder %s801_s24, 6   ;;  %s970_s12 = smov %s708_s13 }
 0x185   : > { %s971_s13 = smov %s712_s14  ;;  %s972_s14 = smov %s827_s17 }
 0x186   : > { %s973_s15 = smov %s801_s24  ;;  %19 = sbr.rel (!%p17_p7) target bundleno = 6 (0x6), region = 81 }
 0x18d   :  { %386 = vsyncpa [#allocation3], 1 }
 0x18e   :  { %388 = vsyncpa [#allocation3 + $0x1], 1 }
 0x18f   :  { %389 = vsyncpa [#allocation6], 1 }
 0x190   :  { %390 = vsyncpa [#allocation4], 1 }
 0x191   :  { %392 = vsyncpa [#allocation4 + $0x1], 1 }

// kernel: tpu_custom_call.1
= control target key start
LH: loop header
LB: loop body
LE: loop exit
PB: predicated region body
PF: predicated region fallthrough
CT: control target
= control target key end

     0   :  { %8 = vsyncpa [#allocation3], 0  ;;  %s951_s0 = inlined_call_operand.hbm [shape: f32[64,128], index: 0, kind: input, shape index: {}]   ;;  %s952_s1 = inlined_call_operand.hbm [shape: f32[128,256], index: 1, kind: input, shape index: {}]   ;;  %s953_s2 = inlined_call_operand.vmem [shape: f32[1,256], index: 2, kind: input, shape index: {}]   ;;  %s954_s3 = inlined_call_operand.hbm [shape: f32[64,128], index: 3, kind: output, shape index: {}]  }
   0x1   :  { %10 = vsyncpa [#allocation3 + $0x1], 0 }
   0x2   :  { %11 = vsyncpa [#allocation6], 0 }
   0x3   :  { %12 = vsyncpa [#allocation4], 0 }
   0x4   :  { %14 = vsyncpa [#allocation4 + $0x1], 0  ;;  %s748_s12 = smov 0   ;;  %s750_s13 = smov 0  }
   0x5   :  { %s752_s14 = smov 0   ;;  %s754_s15 = smov 0  }
   0x6 LB: > { %s769_s16 = sadd.s32 4294967295, %s716_s15   ;;  %s448_s17 = sadd.s32 4294967294, %s716_s15   ;;  %s716_s15 = sphi %s754_s15, %s973_s15   ;;  %s712_s14 = sphi %s752_s14, %s972_s14   ;;  %s708_s13 = sphi %s750_s13, %s971_s13   ;;  %s704_s12 = sphi %s748_s12, %s970_s12  }
   0x7   : > { %p40_p0 = scmp.ne.s32.totalorder %s708_s13, %s704_s12  ;;  %p955_p1 = scmp.eq.s32.totalorder %s769_s16, 0 }
   0x8   : > { %p112_p3 = scmp.eq.s32.totalorder %s448_s17, 3  ;;  %p449_p5 = scmp.ge.s32.totalorder %s716_s15, 1 }
   0x9   : > { %p778_p4 = por %p955_p1, %p40_p0  ;;  %p119_p7 = scmp.lt.s32.totalorder %s716_s15, 5 }
   0xa   : > { %p783_p6 = por %p112_p3, %p40_p0  ;;  %s718_s21 = smov [#allocation5]  }
   0xb   : > { %s958_s18 = scalar_select %p778_p4, 1, 0 }
   0xc   : > { %s959_s19 = scalar_select %p783_p6, 1, 0 }
   0xd   : > { %p788_p8 = pnand %p449_p5, %p119_p7  ;;  %s131_s22 = sshll.u32 %s718_s21, 4  ;;  %s132_s22 = int_to_ptr.vmem [resolvable:$true] %s131_s22 }
   0xe   : > { %s801_s24 = sadd.s32 1, %s716_s15   ;;  %s27_s25 = sadd.s32 1, %s712_s14 }
   0xf   : > { %s960_s20 = scalar_select %p788_p8, 1, 0 }
  0x10   : > { %p524_p9 = pneg %p788_p8  ;;  %s24_s26 = ssub.s32 %s716_s15, %s801_s24 }
  0x11   : > { %s588_s29 = scalar_lea.hbm %s952_s1, 4096 }
  0x12   : > { %p796_p10 = pnand %p524_p9, %p955_p1  ;;  %p589_p11 = scmp.ne.s32.totalorder %s952_s1, %s588_s29 }
  0x13   : > { %p595_p3 = scmp.lt.u32.totalorder %s588_s29, %s952_s1 }
  0x14   : > { %p590_p12 = pneg %p796_p10 }
  0x16   : > { %p591_p13 = pnand %p590_p12, %p589_p11 }
  0x18   : > { %p592_p0 = pneg %p591_p13 }
  0x1a   : > { %p597_p5 = pnand %p595_p3, %p592_p0 }
  0x1c   : > { %600 = shalt.err (!%p597_p5)
}
  0x1d   : > { %s601_s7 = scalar_lea.vmem %s132_s22, 4096  ;;  %p609_p2 = scmp.lt.s32.totalorder %s132_s22, %s132_s22 }
  0x1e   : > { %p602_p7 = scmp.ne.s32.totalorder %s132_s22, %s601_s7  ;;  %p610_p6 = scmp.lt.s32.totalorder %s601_s7, %s601_s7 }
  0x20   : > { %p604_p9 = pnand %p602_p7, %p590_p12  ;;  %p611_p4 = por %p610_p6, %p609_p2 }
  0x22   : > { %p605_p1 = pneg %p604_p9 }
  0x24   : > { %p612_p8 = pnand %p611_p4, %p605_p1 }
  0x26   : > { %615 = shalt.err (!%p612_p8)
}
  0x27   : > { %s719_s8 = smov 256   ;;  %s720_s9 = smov 16  }
  0x28   : > { %527 = dma.hbm_to_vmem [thread:$0]  (!%p796_p10), %s952_s1, 4096, %s132_s22, [#allocation6], %s719_s8, %s719_s8, %s720_s9  }
  0x29   : > { %p25_p11 = scmp.eq.s32.totalorder %s24_s26, 0  ;;  %p34_p2 = scmp.ne.s32.totalorder %s712_s14, %s708_s13 }
  0x2a   : > { %p35_p1 = scmp.eq.s32.totalorder %s716_s15, 0  ;;  %p537_p4 = scmp.lt.s32.totalorder %s716_s15, 4 }
  0x2b   : > { %s827_s17 = scalar_select %p25_p11, %s712_s14, %s27_s25  }
  0x2c   : > { %p36_p6 = por %p35_p1, %p34_p2  ;;  %p962_p8 = scmp.eq.s32.totalorder %s769_s16, 3 }
  0x2d   : > { %s148_s27 = sand.u32 1, %s712_s14   ;;  %s466_s28 = sshll.u32 %s716_s15, 8 }
  0x2e   : > { %p831_p12 = por %p962_p8, %p34_p2  ;;  %s452_s29 = sshll.u32 %s148_s27, 4 }
  0x2f   : > { %s840_s4 = scalar_lea.hbm %s951_s0, %s466_s28  ;;  %s152_s22 = scalar_lea.vmem [#allocation2], %s452_s29 }
  0x30   : > { %s159_s25 = sshll.u32 %s152_s22, 4  ;;  %p842_p10 = pnand %p537_p4, %p36_p6  ;;  %s846_s25 = int_to_ptr.vmem [resolvable:$true] %s159_s25 }
  0x31   : > { %s848_s5 = scalar_lea.sflag [#allocation3], %s148_s27  ;;  %s616_s6 = scalar_lea.hbm %s840_s4, 256 }
  0x32   : > { %p617_p13 = scmp.ne.s32.totalorder %s840_s4, %s616_s6  ;;  %p618_p0 = pneg %p842_p10 }
  0x33   : > { %s621_s9 = scalar_lea.hbm %s951_s0, 1024  ;;  %p622_p7 = scmp.lt.u32.totalorder %s840_s4, %s951_s0 }
  0x34   : > { %p619_p3 = pnand %p618_p0, %p617_p13  ;;  %p623_p9 = scmp.lt.u32.totalorder %s621_s9, %s616_s6 }
  0x35   : > { %p625_p2 = scmp.lt.u32.totalorder %s616_s6, %s840_s4 }
  0x36   : > { %p620_p5 = pneg %p619_p3  ;;  %p624_p11 = por %p623_p9, %p622_p7 }
  0x38   : > { %p626_p1 = por %p625_p2, %p624_p11 }
  0x3a   : > { %p627_p4 = pnand %p626_p1, %p620_p5 }
  0x3c   : > { %630 = shalt.err (!%p627_p4)
}
  0x3d   : > { %s631_s27 = scalar_lea.vmem %s846_s25, 256  ;;  %s721_s28 = smov [#allocation2]  }
  0x3e   : > { %p632_p6 = scmp.ne.s32.totalorder %s846_s25, %s631_s27  ;;  %s636_s29 = sshll.u32 %s721_s28, 4  ;;  %s637_s29 = int_to_ptr.vmem [resolvable:$false] %s636_s29 }
  0x3f   : > { %s638_s23 = scalar_lea.vmem %s637_s29, 512  ;;  %p639_p3 = scmp.lt.s32.totalorder %s846_s25, %s637_s29 }
  0x40   : > { %p634_p8 = pnand %p632_p6, %p618_p0  ;;  %p640_p7 = scmp.lt.s32.totalorder %s638_s23, %s631_s27 }
  0x42   : > { %p635_p13 = pneg %p634_p8  ;;  %p641_p9 = por %p640_p7, %p639_p3 }
  0x44   : > { %p642_p11 = pnand %p641_p9, %p635_p13 }
  0x46   : > { %645 = shalt.err (!%p642_p11)
}
  0x47   : > { %s722_s30 = smov 128   ;;  %s723_s22 = smov 8  }
  0x48   : > { %531 = dma.hbm_to_vmem [thread:$0]  (!%p842_p10), %s840_s4, 256, %s846_s25, %s848_s5, %s722_s30, %s722_s30, %s723_s22  }
  0x49   : > { %p965_p0 = scmp.ne.s32.totalorder %s960_s20, 0 }
  0x4a   : > { %s879_s6 = sand.u32 (!%p965_p0), 1, %s708_s13   ;;  %p966_p5 = scmp.ne.s32.totalorder (!%p965_p0), %s958_s18, 0 }
  0x4b   : > { %171 = sbr.rel (%p965_p0) target bundleno = 382 (0x17e), region = 32  ;;  %s456_s7 = sshll.u32 (!%p965_p0), %s879_s6, 4 }
  0x4c   : > { %s174_s8 = scalar_lea.sflag (!%p965_p0), [#allocation3], %s879_s6  ;;  %s885_s9 = scalar_lea.vmem (!%p965_p0), [#allocation2], %s456_s7 }
  0x52   : > { %691 = dma.done.wait (%p966_p5), %s174_s8, 256  }
  0x53   : > { %693 = vsyncadd (%p966_p5), %s174_s8, 4294967040  ;;  %p967_p10 = scmp.eq.s32.totalorder %s769_s16, 0 }
  0x55   : > { %695 = dma.done.wait (%p967_p10), [#allocation6], 4096   ;;  %p968_p2 = pmov %p967_p10 }
  0x56   : > { %v724_v0 = vmov 0.0   ;;  %v209_v1 = vld [vmem:[#allocation5 + $0x8] sm:$0xff]  ;;  %v211_v2 = vld [vmem:[#allocation5 + $0x18] sm:$0xff]  ;;  %v208_v3 = vld [vmem:[#allocation5] sm:$0xff]  ;;  %v242_v51 = vlaneseq  ;;  %s467_s4 = sshll.u32 %s769_s16, 8  ;;  %s203_s25 = scalar_lea.vmem [#allocation7], %s456_s7 }
  0x57   : > { %697 = vsyncadd (%p968_p2), [#allocation6], 4294963200  ;;  %316 = vmatprep.mubr.f32.mxu0 %v724_v0  ;;  %322 = vmatprep.mubr.f32.mxu1 %v724_v0  ;;  %v468_v4 = vpack.c.bf16 %v211_v2, %v209_v1  ;;  %v210_v5 = vld [vmem:[#allocation5 + $0x10] sm:$0xff]  ;;  %v213_v6 = vld [vmem:[#allocation5 + $0x28] sm:$0xff]  ;;  %s365_s26 = sshll.u32 %s203_s25, 4  ;;  %s906_s11 = scalar_lea.hbm %s954_s3, %s467_s4  ;;  %s908_s26 = int_to_ptr.vmem [resolvable:$true] %s365_s26 }
  0x58   : > { %v215_v7 = vld [vmem:[#allocation5 + $0x38] sm:$0xff]  ;;  %v470_v8 = vpack.c.bf16 %v210_v5, %v208_v3  ;;  %v212_v10 = vld [vmem:[#allocation5 + $0x20] sm:$0xff]  ;;  %v214_v11 = vld [vmem:[#allocation5 + $0x30] sm:$0xff]  ;;  %v243_v52 = vshrl.u32 %v242_v51, 7  ;;  %s352_s16 = scalar_lea.sflag [#allocation4], %s879_s6  ;;  %s646_s27 = scalar_lea.vmem %s908_s26, 256 }
  0x59   : > { %v472_v9 = vpack.c.bf16 %v215_v7, %v213_v6  ;;  %v217_v12 = vld [vmem:[#allocation5 + $0x48] sm:$0xff]  ;;  %469 = vmatprep.subr.bf16.mxu0 %v468_v4  ;;  %500 = vmatprep.subr.bf16.mxu1 %v468_v4  ;;  %v219_v13 = vld [vmem:[#allocation5 + $0x58] sm:$0xff]  ;;  %v474_v14 = vpack.c.bf16 %v214_v11, %v212_v10  ;;  %v216_v16 = vld [vmem:[#allocation5 + $0x40] sm:$0xff]  ;;  %p647_p1 = scmp.ne.s32.totalorder %s908_s26, %s646_s27  ;;  %s725_s28 = smov [#allocation7]  }
  0x5a   : > { %471 = vmatpush1.bf16.msra.mxu0 %v470_v8  ;;  %508 = vmatpush1.bf16.msra.mxu1 %v470_v8  ;;  %v476_v15 = vpack.c.bf16 %v219_v13, %v217_v12  ;;  %v218_v17 = vld [vmem:[#allocation5 + $0x50] sm:$0xff]  ;;  %v221_v18 = vld [vmem:[#allocation5 + $0x68] sm:$0xff]  ;;  %v223_v19 = vld [vmem:[#allocation5 + $0x78] sm:$0xff]  ;;  %v248_v53 = vsub.s32 1, %v243_v52  ;;  %v244_v0 = vsub.s32 0, %v243_v52  ;;  %s650_s29 = sshll.u32 %s725_s28, 4  ;;  %s651_s29 = int_to_ptr.vmem [resolvable:$false] %s650_s29 }
  0x5b   : > { %473 = vmatprep.subr.bf16.mxu0 %v472_v9  ;;  %501 = vmatprep.subr.bf16.mxu1 %v472_v9  ;;  %v478_v20 = vpack.c.bf16 %v218_v17, %v216_v16  ;;  %v480_v21 = vpack.c.bf16 %v223_v19, %v221_v18  ;;  %v220_v22 = vld [vmem:[#allocation5 + $0x60] sm:$0xff]  ;;  %v222_v23 = vld [vmem:[#allocation5 + $0x70] sm:$0xff]  ;;  %v225_v24 = vld [vmem:[#allocation5 + $0x88] sm:$0xff]  ;;  %p648_p4 = pnand %p647_p1, %p831_p12  ;;  %s652_s23 = scalar_lea.vmem %s651_s29, 512 }
  0x5c   : > { %v227_v25 = vld [vmem:[#allocation5 + $0x98] sm:$0xff]  ;;  %v482_v26 = vpack.c.bf16 %v222_v23, %v220_v22  ;;  %v224_v28 = vld [vmem:[#allocation5 + $0x80] sm:$0xff]  ;;  %v226_v29 = vld [vmem:[#allocation5 + $0x90] sm:$0xff]  ;;  %p653_p8 = scmp.lt.s32.totalorder %s908_s26, %s651_s29  ;;  %p654_p13 = scmp.lt.s32.totalorder %s652_s23, %s646_s27 }
  0x5d   : > { %v484_v27 = vpack.c.bf16 %v227_v25, %v225_v24  ;;  %v229_v30 = vld [vmem:[#allocation5 + $0xa8] sm:$0xff]  ;;  %v231_v31 = vld [vmem:[#allocation5 + $0xb8] sm:$0xff]  ;;  %v486_v32 = vpack.c.bf16 %v226_v29, %v224_v28  ;;  %v228_v34 = vld [vmem:[#allocation5 + $0xa0] sm:$0xff]  ;;  %p649_p6 = pneg %p648_p4 }
  0x5e   : > { %475 = vmatpush1.bf16.msra.mxu0 %v474_v14  ;;  %509 = vmatpush1.bf16.msra.mxu1 %v474_v14  ;;  %v488_v33 = vpack.c.bf16 %v231_v31, %v229_v30  ;;  %v230_v35 = vld [vmem:[#allocation5 + $0xb0] sm:$0xff]  ;;  %v233_v36 = vld [vmem:[#allocation5 + $0xc8] sm:$0xff]  ;;  %v235_v37 = vld [vmem:[#allocation5 + $0xd8] sm:$0xff]  ;;  %p655_p3 = por %p654_p13, %p653_p8 }
  0x5f   : > { %477 = vmatprep.subr.bf16.mxu0 %v476_v15  ;;  %502 = vmatprep.subr.bf16.mxu1 %v476_v15  ;;  %v490_v38 = vpack.c.bf16 %v230_v35, %v228_v34  ;;  %v492_v39 = vpack.c.bf16 %v235_v37, %v233_v36  ;;  %v232_v40 = vld [vmem:[#allocation5 + $0xc0] sm:$0xff]  ;;  %v234_v41 = vld [vmem:[#allocation5 + $0xd0] sm:$0xff]  ;;  %v237_v42 = vld [vmem:[#allocation5 + $0xe8] sm:$0xff] }
  0x60   : > { %v239_v43 = vld [vmem:[#allocation5 + $0xf8] sm:$0xff]  ;;  %v494_v44 = vpack.c.bf16 %v234_v41, %v232_v40  ;;  %v236_v46 = vld [vmem:[#allocation5 + $0xe0] sm:$0xff]  ;;  %v238_v47 = vld [vmem:[#allocation5 + $0xf0] sm:$0xff]  ;;  %p656_p7 = pnand %p655_p3, %p649_p6 }
  0x61   : > { %v496_v45 = vpack.c.bf16 %v239_v43, %v237_v42  ;;  %v498_v48 = vpack.c.bf16 %v238_v47, %v236_v46  ;;  %v206_v49 = vld [vmem:[%s885_s9] sm:$0xff]  ;;  %v207_v50 = vld [vmem:[%s885_s9 + $0x8] sm:$0xff] }
  0x62   : > { %479 = vmatpush1.bf16.msra.mxu0 %v478_v20  ;;  %510 = vmatpush1.bf16.msra.mxu1 %v478_v20  ;;  %v240_v54 = vld [vmem:[%s953_s2] sm:$0x3] }
  0x63   : > { %481 = vmatprep.subr.bf16.mxu0 %v480_v21  ;;  %503 = vmatprep.subr.bf16.mxu1 %v480_v21  ;;  %v249_v55 = vrot.slane %v240_v54, %v248_v53  ;;  %v245_v2 = vrot.slane %v240_v54, %v244_v0 }
  0x66   : > { %483 = vmatpush1.bf16.msra.mxu0 %v482_v26  ;;  %511 = vmatpush1.bf16.msra.mxu1 %v482_v26 }
  0x67   : > { %485 = vmatprep.subr.bf16.mxu0 %v484_v27  ;;  %504 = vmatprep.subr.bf16.mxu1 %v484_v27 }
  0x6a   : > { %487 = vmatpush1.bf16.msra.mxu0 %v486_v32  ;;  %512 = vmatpush1.bf16.msra.mxu1 %v486_v32 }
  0x6b   : > { %489 = vmatprep.subr.bf16.mxu0 %v488_v33  ;;  %505 = vmatprep.subr.bf16.mxu1 %v488_v33 }
  0x6e   : > { %491 = vmatpush1.bf16.msra.mxu0 %v490_v38  ;;  %513 = vmatpush1.bf16.msra.mxu1 %v490_v38 }
  0x6f   : > { %493 = vmatprep.subr.bf16.mxu0 %v492_v39  ;;  %506 = vmatprep.subr.bf16.mxu1 %v492_v39 }
  0x72   : > { %495 = vmatpush1.bf16.msra.mxu0 %v494_v44  ;;  %514 = vmatpush1.bf16.msra.mxu1 %v494_v44 }
  0x73   : > { %497 = vmatprep.subr.bf16.mxu0 %v496_v45  ;;  %507 = vmatprep.subr.bf16.mxu1 %v496_v45 }
  0x76   : > { %499 = vmatpush1.bf16.msra.mxu0 %v498_v48  ;;  %515 = vmatpush1.bf16.msra.mxu1 %v498_v48 }
  0x79   : > { %317 = vmatmul.mubr.f32.vlgmr.msra.gmra.mrb[0].mxu0 %v206_v49  ;;  %323 = vmatmul.mubr.f32.vlgmr.msra.gmra.mrb[0].mxu1 %v207_v50 }
 0x14c   : > { %v318_v56 = vpop.f32.mrb[0].mxu0  ;;  %v324_v57 = vpop.f32.mrb[0].mxu1 }
 0x14d   : > { %v320_v58 = vpop.f32.mrb[1].mxu0  ;;  %v326_v59 = vpop.f32.mrb[1].mxu1  ;;  %v319_v6 = vadd.f32 %v318_v56, %v245_v2  ;;  %v325_v7 = vadd.f32 %v324_v57, %v245_v2 }
 0x14e   : > { %v321_v60 = vadd.f32 %v320_v58, %v249_v55  ;;  %v327_v61 = vadd.f32 %v326_v59, %v249_v55 }
 0x14f   : > { %v329_v8 = vmax.f32 %v319_v6, 0.0  ;;  %v330_v9 = vmax.f32 %v325_v7, 0.0 }
 0x150   : > { %v459_v62 = vmul.f32 -1.442695, %v321_v60  ;;  %v460_v63 = vmul.f32 -1.442695, %v327_v61 }
 0x151   : > { %v343_v10 = vsub.f32 %v329_v8, %v206_v49  ;;  %v344_v12 = vsub.f32 %v330_v9, %v207_v50 }
 0x152   : > { %580 = vpow2.f32 %v459_v62 }
 0x153   : > { %582 = vpow2.f32 %v460_v63 }
 0x15c   : > { %v581_v1 = vpop.eup %580 }
 0x15d   : > { %v583_v3 = vpop.eup %582  ;;  %v337_v4 = vadd.f32 1.0, %v581_v1 }
 0x15e   : > { %v338_v5 = vadd.f32 1.0, %v583_v3 }
 0x15f   : > { %584 = vrcp.f32 %v337_v4 }
 0x160   : > { %586 = vrcp.f32 %v338_v5 }
 0x169   : > { %v585_v11 = vpop.eup %584 }
 0x16a   : > { %v587_v13 = vpop.eup %586  ;;  %v345_v14 = vmul.f32 %v585_v11, %v343_v10 }
 0x16b   : > { %v346_v15 = vmul.f32 %v587_v13, %v344_v12 }
 0x16c   : > { %v347_v16 = vadd.f32 %v345_v14, %v206_v49 }
 0x16d   : > { %v348_v17 = vadd.f32 %v346_v15, %v207_v50 }
 0x16e   : > { %349 = vst [vmem:[%s203_s25] sm:$0xff] %v347_v16 }
 0x16f   : > { %350 = vst [vmem:[%s203_s25 + $0x8] sm:$0xff] %v348_v17 }
 0x170   : > { %659 = shalt.err (!%p656_p7)
}
 0x171   : > { %s660_s30 = scalar_lea.hbm %s906_s11, 256  ;;  %s664_s8 = scalar_lea.hbm %s954_s3, 1024 }
 0x172   : > { %p661_p9 = scmp.ne.s32.totalorder %s906_s11, %s660_s30  ;;  %p665_p5 = scmp.lt.u32.totalorder %s906_s11, %s954_s3 }
 0x173   : > { %p666_p10 = scmp.lt.u32.totalorder %s664_s8, %s660_s30  ;;  %p668_p1 = scmp.lt.u32.totalorder %s660_s30, %s906_s11 }
 0x174   : > { %p662_p11 = pnand %p661_p9, %p831_p12 }
 0x175   : > { %p667_p2 = por %p666_p10, %p665_p5 }
 0x176   : > { %p663_p0 = pneg %p662_p11 }
 0x177   : > { %p669_p4 = por %p668_p1, %p667_p2 }
 0x179   : > { %p670_p6 = pnand %p669_p4, %p663_p0 }
 0x17b   : > { %673 = shalt.err (!%p670_p6)
}
 0x17c   : > { %s726_s20 = smov 128   ;;  %s727_s4 = smov 8  }
 0x17d   : > { %522 = dma.vmem_to_hbm [thread:$0]  (%p831_p12), %s908_s26, 256, %s906_s11, %s352_s16, %s726_s20, %s726_s20, %s727_s4  }
 0x17e PF: > { %p539_p8 = scmp.ge.s32.totalorder %s716_s15, 2  ;;  %s380_s25 = sand.u32 1, %s704_s12  }
 0x17f   : > { %p969_p13 = scmp.ne.s32.totalorder %s959_s19, 0  ;;  %s381_s5 = scalar_lea.sflag [#allocation4], %s380_s25 }
 0x181   : > { %p533_p3 = pnand %p539_p8, %p969_p13 }
 0x183   : > { %699 = dma.done.wait (!%p533_p3), %s381_s5, 256  }
 0x184   : > { %701 = vsyncadd (!%p533_p3), %s381_s5, 4294967040  ;;  %p17_p7 = scmp.ge.s32.totalorder %s801_s24, 6   ;;  %s970_s12 = smov %s708_s13 }
 0x185   : > { %s971_s13 = smov %s712_s14  ;;  %s972_s14 = smov %s827_s17 }
 0x186   : > { %s973_s15 = smov %s801_s24  ;;  %19 = sbr.rel (!%p17_p7) target bundleno = 6 (0x6), region = 81 }
 0x18d   :  { %386 = vsyncpa [#allocation3], 1 }
 0x18e   :  { %388 = vsyncpa [#allocation3 + $0x1], 1 }
 0x18f   :  { %389 = vsyncpa [#allocation6], 1 }
 0x190   :  { %390 = vsyncpa [#allocation4], 1 }
 0x191   :  { %392 = vsyncpa [#allocation4 + $0x1], 1 }

</bundles_post_ra>
